<compile_context>
chip_gen: v6e
topology: v6e:2x2x1
jax: 0.10.0
libtpu: 0.0.40
codegen_flags: <defaults>
</compile_context>

<pallas_src>
import functools

import jax
import jax.numpy as jnp
from jax.experimental import pallas as pl
from jax.experimental.pallas import tpu as pltpu


def _ltv_kernel(mask_w_ref, mask_h_ref, x_ref, out_ref, *, w):
    """Per-batch-element masked TV partial sum over all 24 used channels."""
    x = x_ref[0].astype(jnp.float32)            # (24, H*W)
    hw = x.shape[1]

    # Masks carry 1/count_w (resp. 1/count_h) on valid positions and 0 where
    # the rolled neighbor would wrap around a row / image boundary.
    mw = mask_w_ref[...]                        # (1, H*W)
    mh = mask_h_ref[...]                        # (1, H*W)

    # Right neighbor x[c, h, w+1] lives at flat index i+1, down neighbor
    # x[c, h+1, w] at i+W.  roll semantics: out[j] = x[(j - shift) mod n], so
    # shift = hw - k brings element i+k to position i; wrap terms are zeroed
    # by the masks.
    x_right = pltpu.roll(x, shift=hw - 1, axis=1)
    x_down = pltpu.roll(x, shift=hw - w, axis=1)

    dw = x_right - x
    dh = x_down - x
    e = dw * dw * mw + dh * dh * mh             # (24, H*W)

    out_ref[0] = jnp.sum(e, keepdims=True)      # single (1, 1) block write


def l_tv_r_pallas(r, tv_loss_weight=1.0):
    B, C, H, W = r.shape
    n_groups = 8
    used_c = 3 * n_groups
    assert C >= used_c, f"L_TV_R needs at least {used_c} channels, got {C}"
    assert H > 1 and W > 1

    # Lane-dense layout: merge H and W (free reshape of contiguous dims).
    x = r[:, :used_c].reshape(B, used_c, H * W)

    count_h = (H - 1) * W
    count_w = H * (W - 1)

    # Grid-invariant boundary masks with the 1/count factors folded in.
    idx = jnp.arange(H * W, dtype=jnp.int32)
    mask_w = jnp.where((idx % W) < (W - 1),
                       jnp.float32(1.0 / count_w), jnp.float32(0.0))
    mask_h = jnp.where(idx < (H - 1) * W,
                       jnp.float32(1.0 / count_h), jnp.float32(0.0))
    mask_w = mask_w.reshape(1, H * W)
    mask_h = mask_h.reshape(1, H * W)

    kernel = functools.partial(_ltv_kernel, w=W)

    bytes_accessed = x.size * x.dtype.itemsize + 2 * H * W * 4 + B * 4
    flops = 8 * B * used_c * H * W   # subs, squares, mask muls, adds, reduce

    per_batch = pl.pallas_call(
        kernel,
        out_shape=jax.ShapeDtypeStruct((B, 1, 1), jnp.float32),
        grid_spec=pltpu.PrefetchScalarGridSpec(
            num_scalar_prefetch=0,
            grid=(B,),
            in_specs=[
                pl.BlockSpec((1, H * W), lambda b: (0, 0)),        # mask_w (resident)
                pl.BlockSpec((1, H * W), lambda b: (0, 0)),        # mask_h (resident)
                pl.BlockSpec((1, used_c, H * W), lambda b: (b, 0, 0)),
            ],
            out_specs=pl.BlockSpec((1, 1, 1), lambda b: (b, 0, 0)),
        ),
        compiler_params=pltpu.CompilerParams(
            dimension_semantics=("parallel",)),
        cost_estimate=pl.CostEstimate(
            flops=flops, transcendentals=0, bytes_accessed=bytes_accessed),
    )(mask_w, mask_h, x)

    # TODO(synk): for very large images (24*H*W*4 bytes approaching the scoped
    # VMEM limit) add an H-tiling grid axis with halo handling for the
    # vertical diffs; unnecessary at typical Zero-DCE resolutions.
    return (tv_loss_weight * jnp.sum(per_batch) / (n_groups * B)).astype(
        jnp.float32)


def l_tv_r_reference(r, tv_loss_weight=1.0):
    """Pure-JAX reference matching the PyTorch L_TV_R module exactly."""
    B, _, H, W = r.shape
    count_h = (H - 1) * W
    count_w = H * (W - 1)
    loss = jnp.float32(0.0)
    for i in range(8):
        xg = r[:, i * 3:(i + 1) * 3].astype(jnp.float32)
        h_tv = jnp.sum(jnp.square(xg[:, :, 1:, :] - xg[:, :, :-1, :]))
        w_tv = jnp.sum(jnp.square(xg[:, :, :, 1:] - xg[:, :, :, :-1]))
        loss = loss + tv_loss_weight * (h_tv / count_h + w_tv / count_w) / B
    return loss / 8.0


if __name__ == "__main__":
    key = jax.random.PRNGKey(0)
    B, C, H, W = 2, 24, 16, 16   # 24 channels = 8 groups x 3 (module spec)
    r = jax.random.uniform(key, (B, C, H, W), dtype=jnp.float32)

    out = jax.block_until_ready(l_tv_r_pallas(r))
    ref = jax.block_until_ready(l_tv_r_reference(r))

    assert out.shape == (), f"expected scalar, got {out.shape}"
    assert jnp.allclose(out, ref, rtol=1e-4, atol=1e-6), (out, ref)
    print("KERNEL_OK")
</pallas_src>

<mosaic_0001>
module attributes {stable_mosaic.version = 11 : i64} {
  func.func @_ltv_kernel(%arg0: i32, %arg1: memref<1x256xf32, #tpu.memory_space<vmem>>, %arg2: memref<1x256xf32, #tpu.memory_space<vmem>>, %arg3: memref<1x24x256xf32, #tpu.memory_space<vmem>>, %arg4: memref<1x1x1xf32, #tpu.memory_space<vmem>>) attributes {dimension_semantics = [#tpu.dimension_semantics<parallel>], iteration_bounds = array<i64: 2>, scalar_prefetch = 0 : i64, scratch_operands = 0 : i64, tpu.core_type = #tpu.core_type<tc>, window_params = [{pipeline_mode = #tpu.pipeline_mode<synchronous>, transform_indices = @transform_0, window_bounds = array<i64: 1, 256>}, {pipeline_mode = #tpu.pipeline_mode<synchronous>, transform_indices = @transform_1, window_bounds = array<i64: 1, 256>}, {transform_indices = @transform_2, window_bounds = array<i64: 1, 24, 256>}, {transform_indices = @transform_3, window_bounds = array<i64: 1, 1, 1>}]} {
    %c0 = arith.constant 0 : index
    %c0_0 = arith.constant 0 : index
    %c0_1 = arith.constant 0 : index
    %0 = vector.load %arg3[%c0, %c0_0, %c0_1] : memref<1x24x256xf32, #tpu.memory_space<vmem>>, vector<1x24x256xf32>
    %1 = vector.shape_cast %0 : vector<1x24x256xf32> to vector<24x256xf32>
    %c0_2 = arith.constant 0 : index
    %c0_3 = arith.constant 0 : index
    %2 = vector.load %arg1[%c0_2, %c0_3] : memref<1x256xf32, #tpu.memory_space<vmem>>, vector<1x256xf32>
    %c0_4 = arith.constant 0 : index
    %c0_5 = arith.constant 0 : index
    %3 = vector.load %arg2[%c0_4, %c0_5] : memref<1x256xf32, #tpu.memory_space<vmem>>, vector<1x256xf32>
    %c255_i32 = arith.constant 255 : i32
    %4 = tpu.dynamic_rotate %1 by %c255_i32 dim 1 : vector<24x256xf32>, i32 -> vector<24x256xf32>
    %c240_i32 = arith.constant 240 : i32
    %5 = tpu.dynamic_rotate %1 by %c240_i32 dim 1 : vector<24x256xf32>, i32 -> vector<24x256xf32>
    %6 = arith.subf %4, %1 : vector<24x256xf32>
    %7 = arith.subf %5, %1 : vector<24x256xf32>
    %8 = arith.mulf %6, %6 : vector<24x256xf32>
    %9 = vector.broadcast %2 : vector<1x256xf32> to vector<24x256xf32>
    %10 = arith.mulf %8, %9 : vector<24x256xf32>
    %11 = arith.mulf %7, %7 : vector<24x256xf32>
    %12 = vector.broadcast %3 : vector<1x256xf32> to vector<24x256xf32>
    %13 = arith.mulf %11, %12 : vector<24x256xf32>
    %14 = arith.addf %10, %13 : vector<24x256xf32>
    %15 = vector.shape_cast %14 : vector<24x256xf32> to vector<1x24x256xf32>
    %cst = arith.constant dense<0.000000e+00> : vector<1xf32>
    %16 = vector.multi_reduction <add>, %15, %cst [1, 2] : vector<1x24x256xf32> to vector<1xf32>
    %17 = vector.shape_cast %16 : vector<1xf32> to vector<1x1x1xf32>
    %18 = vector.extract %17[0, 0, 0] : f32 from vector<1x1x1xf32>
    %19 = vector.broadcast %18 : f32 to vector<1x1xf32>
    %c0_6 = arith.constant 0 : index
    %c0_7 = arith.constant 0 : index
    %c0_8 = arith.constant 0 : index
    %20 = vector.load %arg4[%c0_6, %c0_7, %c0_8] : memref<1x1x1xf32, #tpu.memory_space<vmem>>, vector<1x1x1xf32>
    %21 = vector.shape_cast %20 : vector<1x1x1xf32> to vector<1x1xf32>
    %22 = vector.shape_cast %19 : vector<1x1xf32> to vector<1x1x1xf32>
    tpu.vector_store %arg4[%c0_6, %c0_7, %c0_8], %22 {strides = array<i32>} : memref<1x1x1xf32, #tpu.memory_space<vmem>>, vector<1x1x1xf32>,
    return
  }
  func.func @transform_0(%arg0: i32) -> (i32, i32) {
    %c0_i32 = arith.constant 0 : i32
    %c0_i32_0 = arith.constant 0 : i32
    %c0_i32_1 = arith.constant 0 : i32
    return %c0_i32, %c0_i32_0 : i32, i32
  }
  func.func @transform_1(%arg0: i32) -> (i32, i32) {
    %c0_i32 = arith.constant 0 : i32
    %c0_i32_0 = arith.constant 0 : i32
    %c0_i32_1 = arith.constant 0 : i32
    return %c0_i32, %c0_i32_0 : i32, i32
  }
  func.func @transform_2(%arg0: i32) -> (i32, i32, i32) {
    %c0_i32 = arith.constant 0 : i32
    %c0_i32_0 = arith.constant 0 : i32
    %c0_i32_1 = arith.constant 0 : i32
    return %arg0, %c0_i32, %c0_i32_0 : i32, i32, i32
  }
  func.func @transform_3(%arg0: i32) -> (i32, i32, i32) {
    %c0_i32 = arith.constant 0 : i32
    %c0_i32_0 = arith.constant 0 : i32
    %c0_i32_1 = arith.constant 0 : i32
    return %arg0, %c0_i32, %c0_i32_0 : i32, i32, i32
  }
}

</mosaic_0001>

<bundles_post_ra>
// kernel: tpu_custom_call.1
= control target key start
LH: loop header
LB: loop body
LE: loop exit
PB: predicated region body
PF: predicated region fallthrough
CT: control target
= control target key end

     0   :  { %8 = vsyncpa [#allocation3], 0  ;;  %s837_s0 = inlined_call_operand.hbm [shape: f32[1,256], index: 0, kind: input, shape index: {}]   ;;  %s838_s1 = inlined_call_operand.hbm [shape: f32[1,256], index: 1, kind: input, shape index: {}]   ;;  %s839_s2 = inlined_call_operand.hbm [shape: f32[2,24,256], index: 2, kind: input, shape index: {}]   ;;  %s840_s3 = inlined_call_operand.vmem [shape: f32[2,1,1], index: 3, kind: output, shape index: {}]  }
   0x1   :  { %9 = vsyncpa [#allocation5], 0  ;;  %s648_s12 = smov 0   ;;  %s650_s13 = smov 0  }
   0x2   :  { %s652_s14 = smov 0   ;;  %s654_s15 = smov 0  }
   0x3 LB: > { %s667_s16 = sadd.s32 4294967295, %s619_s15   ;;  %s670_s17 = sadd.s32 1, %s619_s15   ;;  %s619_s15 = sphi %s654_s15, %s858_s15   ;;  %s615_s14 = sphi %s652_s14, %s857_s14   ;;  %s611_s13 = sphi %s650_s13, %s856_s13   ;;  %s607_s12 = sphi %s648_s12, %s855_s12  }
   0x4   : > { %s61_s18 = ssub.s32 %s619_s15, %s670_s17  ;;  %s64_s19 = sadd.s32 1, %s615_s14 }
   0x5   : > { %p62_p0 = scmp.eq.s32.totalorder %s61_s18, 0  ;;  %p71_p1 = scmp.ne.s32.totalorder %s615_s14, %s611_s13 }
   0x6   : > { %p72_p2 = scmp.eq.s32.totalorder %s619_s15, 0  ;;  %p77_p3 = scmp.ne.s32.totalorder %s611_s13, %s607_s12 }
   0x7   : > { %s680_s20 = scalar_select %p62_p0, %s615_s14, %s64_s19  }
   0x8   : > { %p682_p4 = por %p72_p2, %p71_p1  ;;  %p841_p5 = scmp.eq.s32.totalorder %s667_s16, 0 }
   0x9   : > { %p418_p6 = scmp.ge.s32.totalorder %s619_s15, 1  ;;  %p114_p7 = scmp.lt.s32.totalorder %s619_s15, 3 }
   0xa   : > { %p691_p8 = por %p841_p5, %p77_p3  ;;  %s621_s24 = smov [#allocation2]  }
   0xb   : > { %p695_p9 = pnand %p418_p6, %p114_p7  ;;  %s127_s25 = sshll.u32 %s621_s24, 4  ;;  %s128_s25 = int_to_ptr.vmem [resolvable:$true] %s127_s25 }
   0xc   : > { %s845_s22 = scalar_select %p691_p8, 1, 0 }
   0xd   : > { %s846_s23 = scalar_select %p695_p9, 1, 0 }
   0xe   : > { %p443_p10 = pneg %p695_p9  ;;  %p456_p11 = scmp.lt.s32.totalorder %s619_s15, 2 }
   0xf   : > { %s622_s27 = smov [#allocation4]   ;;  %s508_s30 = scalar_lea.vmem %s128_s25, 32 }
  0x10   : > { %p704_p12 = pnand %p443_p10, %p841_p5  ;;  %s138_s28 = sshll.u32 %s622_s27, 4  ;;  %s139_s28 = int_to_ptr.vmem [resolvable:$true] %s138_s28 }
  0x11   : > { %p710_p13 = pnand %p456_p11, %p682_p4  ;;  %p509_p1 = scmp.ne.s32.totalorder %s128_s25, %s508_s30 }
  0x12   : > { %p499_p0 = pneg %p704_p12  ;;  %p516_p6 = scmp.lt.s32.totalorder %s128_s25, %s128_s25 }
  0x13   : > { %p517_p7 = scmp.lt.s32.totalorder %s508_s30, %s508_s30 }
  0x14   : > { %p511_p2 = pnand %p509_p1, %p499_p0 }
  0x15   : > { %p518_p10 = por %p517_p7, %p516_p6 }
  0x16   : > { %p512_p3 = pneg %p511_p2 }
  0x18   : > { %p519_p5 = pnand %p518_p10, %p512_p3 }
  0x1a   : > { %522 = shalt.err (!%p519_p5)
}
  0x1b   : > { %446 = dma.hbm_to_vmem [thread:$0]  (!%p704_p12), %s837_s0, 32, %s128_s25, [#allocation3]  }
  0x1c   : > { %s149_s6 = sand.u32 1, %s619_s15   ;;  %s534_s7 = scalar_lea.vmem %s139_s28, 32 }
  0x1d   : > { %p535_p4 = scmp.ne.s32.totalorder %s139_s28, %s534_s7  ;;  %p542_p2 = scmp.lt.s32.totalorder %s139_s28, %s139_s28 }
  0x1e   : > { %p543_p8 = scmp.lt.s32.totalorder %s534_s7, %s534_s7 }
  0x1f   : > { %p537_p11 = pnand %p535_p4, %p499_p0 }
  0x20   : > { %p544_p6 = por %p543_p8, %p542_p2 }
  0x21   : > { %p538_p1 = pneg %p537_p11 }
  0x23   : > { %p545_p3 = pnand %p544_p6, %p538_p1 }
  0x25   : > { %548 = shalt.err (!%p545_p3)
}
  0x26   : > { %449 = dma.hbm_to_vmem [thread:$0]  (!%p704_p12), %s838_s1, 32, %s139_s28, [#allocation5]  }
  0x27   : > { %s151_s10 = sand.u32 1, %s615_s14   ;;  %s429_s11 = smul.u32 768, %s619_s15 }
  0x28   : > { %s428_s12 = smul.u32 48, %s151_s10  ;;  %s742_s26 = scalar_lea.sflag [#allocation3], %s149_s6 }
  0x29   : > { %s738_s21 = scalar_lea.hbm %s839_s2, %s429_s11  ;;  %p551_p8 = pneg %p710_p13 }
  0x2a   : > { %s153_s24 = scalar_lea.vmem [#allocation6], %s428_s12  ;;  %s549_s27 = scalar_lea.hbm %s738_s21, 768 }
  0x2b   : > { %s160_s25 = sshll.u32 %s153_s24, 4  ;;  %p550_p5 = scmp.ne.s32.totalorder %s738_s21, %s549_s27  ;;  %s740_s25 = int_to_ptr.vmem [resolvable:$true] %s160_s25 }
  0x2c   : > { %s554_s30 = scalar_lea.hbm %s839_s2, 1536  ;;  %p555_p7 = scmp.lt.s32.totalorder %s738_s21, %s839_s2 }
  0x2d   : > { %p552_p12 = pnand %p551_p8, %p550_p5  ;;  %p556_p10 = scmp.lt.s32.totalorder %s554_s30, %s549_s27 }
  0x2f   : > { %p553_p0 = pneg %p552_p12  ;;  %p557_p4 = por %p556_p10, %p555_p7 }
  0x31   : > { %p558_p11 = pnand %p557_p4, %p553_p0 }
  0x33   : > { %561 = shalt.err (!%p558_p11)
}
  0x34   : > { %s562_s6 = scalar_lea.vmem %s740_s25, 768  ;;  %s623_s7 = smov [#allocation6]  }
  0x35   : > { %p563_p1 = scmp.ne.s32.totalorder %s740_s25, %s562_s6  ;;  %s567_s8 = sshll.u32 %s623_s7, 4  ;;  %s568_s8 = int_to_ptr.vmem [resolvable:$false] %s567_s8 }
  0x36   : > { %s569_s9 = scalar_lea.vmem %s568_s8, 1536  ;;  %p570_p3 = scmp.lt.s32.totalorder %s740_s25, %s568_s8 }
  0x37   : > { %p565_p2 = pnand %p563_p1, %p551_p8  ;;  %p571_p5 = scmp.lt.s32.totalorder %s569_s9, %s562_s6 }
  0x39   : > { %p566_p6 = pneg %p565_p2  ;;  %p572_p12 = por %p571_p5, %p570_p3 }
  0x3b   : > { %p573_p9 = pnand %p572_p12, %p566_p6 }
  0x3d   : > { %576 = shalt.err (!%p573_p9)
}
  0x3e   : > { %s624_s10 = smov 256   ;;  %s625_s11 = smov 16  }
  0x3f   : > { %453 = dma.hbm_to_vmem [thread:$0]  (!%p710_p13), %s738_s21, 768, %s740_s25, %s742_s26, %s624_s10, %s624_s10, %s625_s11  }
  0x40   : > { %p849_p8 = scmp.ne.s32.totalorder %s846_s23, 0 }
  0x41   : > { %p850_p0 = scmp.eq.s32.totalorder (!%p849_p8), %s667_s16, 0 }
  0x42   : > { %172 = sbr.rel (%p849_p8) target bundleno = 431 (0x1af), region = 32 }
  0x47   : > { %594 = dma.done.wait (%p850_p0), [#allocation3], 32   ;;  %p851_p7 = pmov %p850_p0 }
  0x48   : > { %p852_p10 = pmov %p850_p0 }
  0x49   : > { %596 = vsyncadd (%p851_p7), [#allocation3], 4294967264 }
  0x4a   : > { %598 = dma.done.wait (%p852_p10), [#allocation5], 32   ;;  %p853_p9 = pmov %p850_p0 }
  0x4b   : > { %s182_s29 = sand.u32 1, %s667_s16   ;;  %s184_s12 = sand.u32 1, %s611_s13  }
  0x4c   : > { %600 = vsyncadd (%p853_p9), [#allocation5], 4294967264  ;;  %s430_s18 = smul.u32 48, %s184_s12  ;;  %s183_s23 = scalar_lea.sflag [#allocation3], %s182_s29 }
  0x4d   : > { %p854_p13 = scmp.ne.s32.totalorder %s845_s22, 0 }
  0x4e   : > { %s186_s19 = scalar_lea.vmem [#allocation6], %s430_s18 }
  0x4f   : > { %602 = dma.done.wait (%p854_p13), %s183_s23, 768  }
  0x50   : > { %604 = vsyncadd (%p854_p13), %s183_s23, 4294966528  ;;  %v210_v0 = vld [vmem:[%s186_s19] sm:$0xff]  ;;  %s626_s21 = smov 112   ;;  %s627_s24 = smov 127   ;;  %v211_v1 = vld [vmem:[%s186_s19 + $0x8] sm:$0xff]  ;;  %v230_v6 = vlaneseq  ;;  %vm337_vm2 = vcmask 0  }
  0x51   : > { %239 = vrot.lane.b32.xlu1 %v210_v0, %s626_s21  ;;  %218 = vrot.lane.b32.xlu0 %v210_v0, %s627_s24  ;;  %v213_v2 = vld [vmem:[%s186_s19 + $0x18] sm:$0xff]  ;;  %v212_v3 = vld [vmem:[%s186_s19 + $0x10] sm:$0xff]  ;;  %p207_p4 = scmp.lt.s32.totalorder %s667_s16, 1 }
  0x52   : > { %v779_v4 = vld [vmem:[%s186_s19 + $0x28] sm:$0xff]  ;;  %v781_v5 = vld [vmem:[%s186_s19 + $0x20] sm:$0xff]  ;;  %v787_v7 = vand.u32 127, %v230_v6  ;;  %v278_v8 = vshrl.u32 %v230_v6, 7 }
  0x53   : > { %v217_v12 = vld [vmem:[#allocation4] sm:$0x3]  ;;  %v216_v18 = vld [vmem:[#allocation2] sm:$0x3]  ;;  %s860_s16 = smov (!%p207_p4, %s667_s16), 1 }
  0x54   : > { %vm251_vm0 = vcmp.lt.s32.totalorder %v787_v7, 112  ;;  %vm232_vm1 = vcmp.lt.s32.totalorder %v787_v7, 127  ;;  %v279_v11 = vsub.s32 0, %v278_v8  ;;  %v283_v13 = vsub.s32 1, %v278_v8  ;;  %s209_s26 = scalar_lea.vmem %s840_s3, %s860_s16 }
  0x55   : > { %245 = vrot.lane.b32.xlu1 %v211_v1, %s626_s21  ;;  %224 = vrot.lane.b32.xlu0 %v211_v1, %s627_s24 }
  0x56   : > { %v303_v25 = vrot.slane %v217_v12, %v279_v11  ;;  %v307_v26 = vrot.slane %v217_v12, %v283_v13  ;;  %v280_v29 = vrot.slane %v216_v18, %v279_v11  ;;  %v284_v32 = vrot.slane %v216_v18, %v283_v13 }
  0x59   : > { %226 = vrot.lane.b32.xlu1 %v213_v2, %s627_s24  ;;  %220 = vrot.lane.b32.xlu0 %v212_v3, %s627_s24 }
  0x5d   : > { %247 = vrot.lane.b32.xlu1 %v213_v2, %s626_s21  ;;  %241 = vrot.lane.b32.xlu0 %v212_v3, %s626_s21 }
  0x61   : > { %228 = vrot.lane.b32.xlu1 %v779_v4, %s627_s24  ;;  %222 = vrot.lane.b32.xlu0 %v781_v5, %s627_s24 }
  0x65   : > { %249 = vrot.lane.b32.xlu1 %v779_v4, %s626_s21  ;;  %243 = vrot.lane.b32.xlu0 %v781_v5, %s626_s21 }
  0xc3   : > { %v240_v9 = vpop.permute.xlu1 %239  ;;  %v219_v10 = vpop.permute.xlu0 %218 }
  0xc7   : > { %v246_v14 = vpop.permute.xlu1 %245  ;;  %v225_v15 = vpop.permute.xlu0 %224 }
  0xc8   : > { %v252_v16 = vsel %vm251_vm0, %v240_v9, %v246_v14  ;;  %v255_v17 = vsel %vm251_vm0, %v246_v14, %v240_v9  ;;  %v233_v19 = vsel %vm232_vm1, %v219_v10, %v225_v15  ;;  %v236_v20 = vsel %vm232_vm1, %v225_v15, %v219_v10 }
  0xc9   : > { %v264_v21 = vsub.f32 %v252_v16, %v210_v0  ;;  %v265_v22 = vsub.f32 %v255_v17, %v211_v1  ;;  %v258_v23 = vsub.f32 %v233_v19, %v210_v0  ;;  %v259_v24 = vsub.f32 %v236_v20, %v211_v1 }
  0xcb   : > { %v293_v27 = vmul.f32 %v264_v21, %v264_v21  ;;  %v294_v28 = vmul.f32 %v265_v22, %v265_v22  ;;  %v227_v30 = vpop.permute.xlu1 %226  ;;  %v221_v31 = vpop.permute.xlu0 %220  ;;  %v270_v33 = vmul.f32 %v258_v23, %v258_v23  ;;  %v271_v34 = vmul.f32 %v259_v24, %v259_v24 }
  0xcc   : > { %v234_v35 = vsel %vm232_vm1, %v221_v31, %v227_v30  ;;  %v237_v39 = vsel %vm232_vm1, %v227_v30, %v221_v31 }
  0xcd   : > { %v260_v36 = vsub.f32 %v234_v35, %v212_v3  ;;  %v310_v37 = vmul.f32 %v303_v25, %v293_v27  ;;  %v311_v38 = vmul.f32 %v307_v26, %v294_v28  ;;  %v287_v42 = vmul.f32 %v280_v29, %v270_v33 }
  0xce   : > { %v288_v43 = vmul.f32 %v284_v32, %v271_v34  ;;  %v261_v49 = vsub.f32 %v237_v39, %v213_v2 }
  0xcf   : > { %v248_v40 = vpop.permute.xlu1 %247  ;;  %v242_v41 = vpop.permute.xlu0 %241  ;;  %v272_v46 = vmul.f32 %v260_v36, %v260_v36  ;;  %v316_v53 = vadd.f32 %v310_v37, %v287_v42 }
  0xd0   : > { %v253_v44 = vsel %vm251_vm0, %v242_v41, %v248_v40  ;;  %v256_v45 = vsel %vm251_vm0, %v248_v40, %v242_v41  ;;  %v317_v54 = vadd.f32 %v311_v38, %v288_v43  ;;  %v273_v61 = vmul.f32 %v261_v49, %v261_v49 }
  0xd1   : > { %v266_v47 = vsub.f32 %v253_v44, %v212_v3  ;;  %v267_v48 = vsub.f32 %v256_v45, %v213_v2  ;;  %v289_v57 = vmul.f32 %v280_v29, %v272_v46 }
  0xd2   : > { %v322_v2 = vadd.f32 %v317_v54, %v316_v53  ;;  %v290_v12 = vmul.f32 %v284_v32, %v273_v61 }
  0xd3   : > { %v295_v50 = vmul.f32 %v266_v47, %v266_v47  ;;  %v229_v51 = vpop.permute.xlu1 %228  ;;  %v223_v52 = vpop.permute.xlu0 %222  ;;  %v296_v58 = vmul.f32 %v267_v48, %v267_v48 }
  0xd4   : > { %v235_v55 = vsel %vm232_vm1, %v223_v52, %v229_v51  ;;  %v238_v56 = vsel %vm232_vm1, %v229_v51, %v223_v52 }
  0xd5   : > { %v312_v59 = vmul.f32 %v303_v25, %v295_v50  ;;  %v262_v60 = vsub.f32 %v235_v55, %v781_v5  ;;  %v263_v63 = vsub.f32 %v238_v56, %v779_v4  ;;  %v313_v8 = vmul.f32 %v307_v26, %v296_v58 }
  0xd7   : > { %v318_v62 = vadd.f32 %v312_v59, %v289_v57  ;;  %v250_v0 = vpop.permute.xlu1 %249  ;;  %v244_v1 = vpop.permute.xlu0 %243  ;;  %v274_v9 = vmul.f32 %v262_v60, %v262_v60  ;;  %v275_v13 = vmul.f32 %v263_v63, %v263_v63  ;;  %v319_v17 = vadd.f32 %v313_v8, %v290_v12 }
  0xd8   : > { %v254_v3 = vsel %vm251_vm0, %v244_v1, %v250_v0  ;;  %v257_v6 = vsel %vm251_vm0, %v250_v0, %v244_v1 }
  0xd9   : > { %v268_v10 = vsub.f32 %v254_v3, %v781_v5  ;;  %v269_v11 = vsub.f32 %v257_v6, %v779_v4  ;;  %v323_v16 = vadd.f32 %v322_v2, %v318_v62  ;;  %v291_v18 = vmul.f32 %v280_v29, %v274_v9 }
  0xda   : > { %v292_v21 = vmul.f32 %v284_v32, %v275_v13 }
  0xdb   : > { %v297_v14 = vmul.f32 %v268_v10, %v268_v10  ;;  %v298_v15 = vmul.f32 %v269_v11, %v269_v11  ;;  %v324_v22 = vadd.f32 %v323_v16, %v319_v17 }
  0xdd   : > { %v314_v19 = vmul.f32 %v303_v25, %v297_v14  ;;  %v315_v20 = vmul.f32 %v307_v26, %v298_v15 }
  0xdf   : > { %v320_v7 = vadd.f32 %v314_v19, %v291_v18  ;;  %v321_v23 = vadd.f32 %v315_v20, %v292_v21 }
  0xe1   : > { %v325_v24 = vadd.f32 %v324_v22, %v320_v7 }
  0xe3   : > { %v326_v27 = vadd.f32 %v325_v24, %v321_v23 }
  0xe5   : > { %327 = vadd.xlane.f32.xlu0 %v326_v27 }
 0x16e   : > { %v328_v5 = vpop.xlane.xlu0 %327 }
 0x16f   : > { %v329_v4 = vrot.slane %v328_v5, 4 }
 0x171   : > { %v330_v28 = vadd.f32 %v329_v4, %v328_v5 }
 0x173   : > { %v331_v30 = vrot.slane %v330_v28, 2 }
 0x175   : > { %v332_v31 = vadd.f32 %v331_v30, %v330_v28 }
 0x177   : > { %v333_v33 = vrot.slane %v332_v31, 1 }
 0x179   : > { %v334_v34 = vadd.f32 %v333_v33, %v332_v31 }
 0x17b   : > { %431 = vpush %v334_v34 }
 0x1ac   : > { %s432_s27 = spop %431 }
 0x1ad   : > { %v336_v25 = vstv %s432_s27 }
 0x1ae   : > { %338 = vst.msk [vmem:[%s209_s26] sm:$0x1] %vm337_vm2, %v336_v25 }
 0x1af PF: > { %p12_p11 = scmp.ge.s32.totalorder %s670_s17, 4   ;;  %s855_s12 = smov %s611_s13 }
 0x1b0   : > { %s856_s13 = smov %s615_s14  ;;  %s857_s14 = smov %s680_s20 }
 0x1b1   : > { %s858_s15 = smov %s670_s17  ;;  %14 = sbr.rel (!%p12_p11) target bundleno = 3 (0x3), region = 79 }
 0x1b6   :  { %356 = vsyncpa [#allocation3], 1 }
 0x1b7   :  { %358 = vsyncpa [#allocation3 + $0x1], 1 }
 0x1b8   :  { %359 = vsyncpa [#allocation5], 1 }

</bundles_post_ra>
